<compile_context>
chip_gen: v7x
topology: tpu7x:2x2x1
jax: 0.10.0
libtpu: 0.0.40
codegen_flags: <defaults>
</compile_context>

<pallas_src>
import math

import jax
import jax.numpy as jnp
from jax import lax
from jax.experimental import pallas as pl
from jax.experimental.pallas import tpu as pltpu

_F32 = jnp.float32
_NEG_BIG = -1e30            # finite "-inf": masked tiles / empty splits never make inf-inf NaNs
_APPROX_RECIPROCAL = False  # pl.reciprocal(approx=True) (EUP slot) is ~1e-3 relative error;
                            # keep exact division by default for parity with the f32 reference.
_HP = dict(precision="highest")  # host-side matmuls in full f32


def _recip(x):
    if _APPROX_RECIPROCAL:
        return pl.reciprocal(x, approx=True)
    return 1.0 / x


def _softmax_lastdim(x):
    x = x - jnp.max(x, axis=-1, keepdims=True)
    e = jnp.exp(x)
    return e * _recip(jnp.sum(e, axis=-1, keepdims=True))


# ---------------------------------------------------------------------------
# Per-generation VMEM budget / tile sizing
# ---------------------------------------------------------------------------
def _vmem_budget():
    """(per-pipelined-input byte budget, scoped vmem_limit_bytes) per TPU generation.
    v5e/v6e: 128 MiB physical VMEM (default scoped limit is only 16/32 MiB -> raise it).
    v7x: 64 MiB per TensorCore -> keep total residency conservative (~44 MiB)."""
    try:
        vmem = int(pltpu.get_tpu_info().vmem_capacity_bytes)
    except Exception:
        vmem = 64 << 20
    if vmem >= (100 << 20):
        return 16 << 20, 96 << 20
    return 10 << 20, 44 << 20


def _pick_tile(L, E, itemsize, align, budget_bytes, max_tile=None):
    """Largest sequence tile whose double-buffered [tile, E] stream fits the budget
    (512-1024 rows hit ~85% of the HBM roofline); L is padded up to a tile multiple,
    so awkward L never degenerates to tiny tiles or a whole-L block."""
    rows = budget_bytes // (2 * itemsize * max(E, 1))
    rows = int(min(1024, rows))
    if max_tile is not None:
        rows = min(rows, int(max_tile))
    rows = max(align, rows - rows % align)
    if L <= rows:
        tile = -(-L // align) * align
    else:
        tile = rows
    n_tiles = -(-L // tile)
    return tile, tile * n_tiles


def _num_kv_splits(batch, n_tiles):
    """v7x has 2 TensorCores: give the grid a >=2-wide parallel extent when batch == 1
    by splitting the Lk reduction into independent flash partials (combined on host)."""
    if batch >= 2 or n_tiles < 2 or n_tiles % 2:
        return 1
    return 2


# ---------------------------------------------------------------------------
# Kernel A: one pass over the key/value stream.
#   - v projection (plus fused kernel_1 softmax in the shared / self-attention path)
#   - kernel_3 logits (weight-folded through Wk when m <= d_k), online (flash) softmax.
#   The big [tile, E] x tile is only ever the plain LHS of an MXU matmul; the flash
#   accumulator lives in the [d_v, m] orientation so no large transpose is needed.
# ---------------------------------------------------------------------------
def _make_stream_kernel(*, shared, fold3, d_v, tile, t_per, true_len, masked, cdt):
    def kernel(*args):
        it = iter(args)
        x_ref = next(it)
        if shared:
            rhs_ref, bias_ref = next(it), next(it)
        else:
            xv_ref, wv_ref, bv_ref = next(it), next(it), next(it)
        if fold3:
            a3_ref = next(it)
        else:
            wk_ref, ql_ref = next(it), next(it)
        c3_ref = next(it)
        if shared:
            k1_ref = next(it)
        acc_out, l_out, mx_out = next(it), next(it), next(it)
        m_sc, l_sc, acc_sc = next(it), next(it), next(it)

        t = pl.program_id(2)

        @pl.when(t == 0)
        def _():
            m_sc[...] = jnp.full(m_sc.shape, _NEG_BIG, _F32)
            l_sc[...] = jnp.zeros(l_sc.shape, _F32)
            acc_sc[...] = jnp.zeros(acc_sc.shape, _F32)

        x = x_ref[0]                                                    # [tile, E]
        if shared:
            # concatenated [Wv | Bmat] RHS: one matmul gives the v tile and the
            # kernel_1 logits, and kernel B never re-reads x.
            proj = jnp.dot(x, rhs_ref[0], preferred_element_type=_F32) + bias_ref[0]
            v_tile = proj[:, :d_v]                                      # [tile, d_v]
            k1_ref[0] = _softmax_lastdim(proj[:, d_v:]).astype(k1_ref.dtype)
        else:
            v_tile = jnp.dot(xv_ref[0], wv_ref[...],
                             preferred_element_type=_F32) + bv_ref[...]

        if fold3:                                                       # m <= d_k
            s3 = jnp.dot(x, a3_ref[0], preferred_element_type=_F32) + c3_ref[0]
        else:                                                           # m > d_k
            kt = jnp.dot(x, wk_ref[...], preferred_element_type=_F32)   # [tile, d_k]
            s3 = jnp.dot(kt.astype(cdt), ql_ref[0],
                         preferred_element_type=_F32) + c3_ref[0]       # [tile, m]
        if masked:
            row0 = (pl.program_id(1) * t_per + t) * tile
            idx = row0 + lax.broadcasted_iota(jnp.int32, (tile, 1), 0)
            s3 = jnp.where(idx < true_len, s3, _NEG_BIG)

        # online softmax over the streamed key axis (rows of s3); scalars stay f32.
        m_prev = m_sc[...]
        m_new = jnp.maximum(m_prev, jnp.max(s3, axis=0, keepdims=True))   # [1, m]
        alpha = jnp.exp(m_prev - m_new)
        p = jnp.exp(s3 - m_new)                                           # [tile, m]
        l_sc[...] = alpha * l_sc[...] + jnp.sum(p, axis=0, keepdims=True)
        acc_sc[...] = alpha * acc_sc[...] + lax.dot_general(
            v_tile.astype(cdt), p.astype(cdt), (((0,), (0,)), ((), ())),
            preferred_element_type=_F32)                                  # [d_v, m]
        m_sc[...] = m_new

        @pl.when(t == pl.num_programs(2) - 1)
        def _():
            acc_out[0, 0] = acc_sc[...]
            l_out[0, 0] = l_sc[...]
            mx_out[0, 0] = m_sc[...]

    return kernel


# ---------------------------------------------------------------------------
# Kernel B: out = kernel_1 @ right
#   shared path: kernel_1 already computed/stored by kernel A -> plain matmul.
#   general path: kernel_1 = softmax(x_q @ Bmat + c2) computed from the query stream.
# ---------------------------------------------------------------------------
def _k1_matmul_kernel(k1_ref, right_ref, out_ref):
    out_ref[0] = jnp.dot(k1_ref[0], right_ref[0],
                         preferred_element_type=_F32).astype(out_ref.dtype)


def _q_output_kernel(xq_ref, bmat_ref, c2_ref, right_ref, out_ref):
    logits = jnp.dot(xq_ref[0], bmat_ref[0],
                     preferred_element_type=_F32) + c2_ref[0]
    k1 = _softmax_lastdim(logits)
    out_ref[0] = jnp.dot(k1.astype(right_ref.dtype), right_ref[0],
                         preferred_element_type=_F32).astype(out_ref.dtype)


# ---------------------------------------------------------------------------
# Wrapper
# ---------------------------------------------------------------------------
def nystrom_self_attention(query_in, key_in, value_in, params, *, d_k, num_landmarks,
                           compute_dtype=jnp.bfloat16, max_seq_tile=None):
    """Forward of NystromSelfAttention (mask=False, conv_kernel_size=None, inference).

    compute_dtype: dtype of the HBM streams and MXU operands (accumulation stays f32).
      bfloat16 (default) halves HBM traffic and keeps the MXU on its native path;
      pass jnp.float32 for tight parity with an f32 reference.
    max_seq_tile: optional cap on the sequence tile (tuning / testing knob).
    """
    out_dtype = query_in.dtype
    B, Lq, E = query_in.shape
    Lk = key_in.shape[1]
    d_v = params["wv"].shape[1]
    if value_in.shape[1] != Lk:
        raise ValueError("key/value sequence lengths must match")

    # landmark-count adjustment (same loop as the PyTorch forward)
    m = num_landmarks
    while Lk % m != 0 and m > 1:
        m -= 1
    seg = Lk // m
    if Lq != Lk:
        # TODO(synk): decoder self-attention (q_seq_len == 1 -> q_landmarks = query) is
        # not implemented; the reference reshape also requires q_seq_len == k_seq_len.
        raise ValueError("q_seq_len must equal k_seq_len")

    scaling = 1.0 / math.sqrt(math.sqrt(d_k))
    wq, bq = params["wq"].astype(_F32), params["bq"].astype(_F32)
    wk, bk = params["wk"].astype(_F32), params["bk"].astype(_F32)
    wv, bv = params["wv"].astype(_F32), params["bv"].astype(_F32)
    qf, kf, vf = (t.astype(_F32) for t in (query_in, key_in, value_in))

    cdt = jnp.dtype(compute_dtype)
    align = 16 if cdt.itemsize == 2 else 8
    per_input_budget, vmem_limit = _vmem_budget()

    # ---- tiny host-side landmark math (linear projection commutes with the mean) ----
    # TODO(synk): this is one extra HBM pass over x; a fused Pallas pre-kernel could emit
    # the compute_dtype stream copy and the segment means in a single read.
    xq_land = qf.reshape(B, m, Lq // m, E).mean(axis=2)                   # [B, m, E]
    xk_land = kf.reshape(B, m, seg, E).mean(axis=2)                       # [B, m, E]
    q_land = (jnp.einsum("bme,ed->bmd", xq_land, wq, **_HP) + bq) * scaling
    k_land = (jnp.einsum("bme,ed->bmd", xk_land, wk, **_HP) + bk) * scaling

    kernel_2 = jax.nn.softmax(
        jnp.einsum("bmd,bnd->bmn", q_land, k_land, **_HP), axis=-1)       # [B, m, m]
    # TODO(synk): torch.pinverse is an SVD pseudo-inverse with no Pallas/Mosaic
    # equivalent; the tiny [m, m] pinv stays in host JAX (rcond default differs from torch).
    with jax.default_matmul_precision("float32"):
        k2_inv = jnp.linalg.pinv(kernel_2)

    # kernel_1 logits folded through Wq:   logits = x_q @ Bmat + c2
    bmat = scaling * jnp.einsum("ed,bjd->bej", wq, k_land, **_HP)         # [B, E, m]
    c2 = (scaling * jnp.einsum("d,bjd->bj", bq[0], k_land, **_HP))[:, None, :]
    # kernel_3 logits folded through Wk only when m <= d_k (else the folded form
    # inflates MXU work by m/d_k); c3 carries the bias term in both cases.
    fold3 = m <= d_k
    if fold3:
        a3 = scaling * jnp.einsum("bmd,ed->bem", q_land, wk, **_HP)       # [B, E, m]
    else:
        wk_s = scaling * wk                                               # [E, d_k]
        ql3 = jnp.swapaxes(q_land, -1, -2)                                # [B, d_k, m]
    c3 = (scaling * jnp.einsum("bmd,d->bm", q_land, bk[0], **_HP))[:, None, :]

    # ---------------- kernel A: streamed kernel_3 @ v (+ fused kernel_1) ----------------
    shared = (query_in is key_in) and (key_in is value_in)
    tk, L_pad = _pick_tile(Lk, E, cdt.itemsize, align, per_input_budget, max_seq_tile)
    n_tk = L_pad // tk
    S = _num_kv_splits(B, n_tk)
    t_per = n_tk // S
    masked = L_pad != Lk

    def pad_seq(x):
        return x if L_pad == Lk else jnp.pad(x, ((0, 0), (0, L_pad - Lk), (0, 0)))

    x_stream = pad_seq(kf).astype(cdt)
    per_b = lambda s0, s1: pl.BlockSpec((1, s0, s1), lambda b, s, t: (b, 0, 0))
    tile_spec = pl.BlockSpec((1, tk, E), lambda b, s, t: (b, s * t_per + t, 0))

    in_specs, args = [tile_spec], [x_stream]
    if shared:
        rhs_cat = jnp.concatenate(
            [jnp.broadcast_to(wv[None], (B, E, d_v)), bmat], axis=-1).astype(cdt)
        bias_cat = jnp.concatenate(
            [jnp.broadcast_to(bv[None], (B, 1, d_v)), c2], axis=-1)       # f32
        in_specs += [per_b(E, d_v + m), per_b(1, d_v + m)]
        args += [rhs_cat, bias_cat]
    else:
        # TODO(synk): if key_in is value_in but the query differs, this still streams x
        # twice (once for k, once for v); a dedicated single-read variant could halve it.
        xv_stream = pad_seq(vf).astype(cdt)
        in_specs += [tile_spec,
                     pl.BlockSpec((E, d_v), lambda b, s, t: (0, 0)),
                     pl.BlockSpec((1, d_v), lambda b, s, t: (0, 0))]
        args += [xv_stream, wv.astype(cdt), bv]
    if fold3:
        in_specs += [per_b(E, m)]
        args += [a3.astype(cdt)]
    else:
        in_specs += [pl.BlockSpec((E, d_k), lambda b, s, t: (0, 0)), per_b(d_k, m)]
        args += [wk_s.astype(cdt), ql3.astype(cdt)]
    in_specs += [per_b(1, m)]
    args += [c3]

    out_shapes, out_specs = [], []
    if shared:
        out_shapes += [jax.ShapeDtypeStruct((B, L_pad, m), cdt)]
        out_specs += [pl.BlockSpec((1, tk, m), lambda b, s, t: (b, s * t_per + t, 0))]
    out_shapes += [jax.ShapeDtypeStruct((B, S, d_v, m), _F32),
                   jax.ShapeDtypeStruct((B, S, 1, m), _F32),
                   jax.ShapeDtypeStruct((B, S, 1, m), _F32)]
    out_specs += [pl.BlockSpec((1, 1, d_v, m), lambda b, s, t: (b, s, 0, 0)),
                  pl.BlockSpec((1, 1, 1, m), lambda b, s, t: (b, s, 0, 0)),
                  pl.BlockSpec((1, 1, 1, m), lambda b, s, t: (b, s, 0, 0))]

    kernel_a = _make_stream_kernel(shared=shared, fold3=fold3, d_v=d_v, tile=tk,
                                   t_per=t_per, true_len=Lk, masked=masked, cdt=cdt)
    outs = pl.pallas_call(
        kernel_a,
        out_shape=tuple(out_shapes),
        grid=(B, S, t_per),
        in_specs=in_specs,
        out_specs=tuple(out_specs),
        scratch_shapes=[pltpu.VMEM((1, m), _F32), pltpu.VMEM((1, m), _F32),
                        pltpu.VMEM((d_v, m), _F32)],
        compiler_params=pltpu.CompilerParams(
            dimension_semantics=("parallel", "parallel", "arbitrary"),
            vmem_limit_bytes=vmem_limit),
    )(*args)
    if shared:
        k1_pad, acc_p, l_p, mx_p = outs
    else:
        acc_p, l_p, mx_p = outs

    # ------------- host: combine flash partials, tiny pinv reassociation -------------
    mx_all = jnp.max(mx_p, axis=1, keepdims=True)                         # [B,1,1,m]
    w = jnp.exp(mx_p - mx_all)                                            # [B,S,1,m]
    l_tot = jnp.sum(w * l_p, axis=1)                                      # [B,1,m]
    acc_tot = jnp.sum(w * acc_p, axis=1)                                  # [B,d_v,m]
    k3v = jnp.swapaxes(acc_tot / l_tot, -1, -2)                           # [B,m,d_v]
    right = jnp.einsum("bij,bjd->bid", k2_inv, k3v, **_HP)                # [B,m,d_v]

    # ---------------- kernel B: out = kernel_1 @ right ----------------
    cparams_b = pltpu.CompilerParams(dimension_semantics=("parallel", "parallel"),
                                     vmem_limit_bytes=vmem_limit)
    if shared:
        out_pad = pl.pallas_call(
            _k1_matmul_kernel,
            out_shape=jax.ShapeDtypeStruct((B, L_pad, d_v), out_dtype),
            grid=(B, n_tk),
            in_specs=[pl.BlockSpec((1, tk, m), lambda b, t: (b, t, 0)),
                      pl.BlockSpec((1, m, d_v), lambda b, t: (b, 0, 0))],
            out_specs=pl.BlockSpec((1, tk, d_v), lambda b, t: (b, t, 0)),
            compiler_params=cparams_b,
        )(k1_pad, right.astype(cdt))
    else:
        tq, Lq_pad = _pick_tile(Lq, E, cdt.itemsize, align, per_input_budget, max_seq_tile)
        xq_pad = qf if Lq_pad == Lq else jnp.pad(qf, ((0, 0), (0, Lq_pad - Lq), (0, 0)))
        out_pad = pl.pallas_call(
            _q_output_kernel,
            out_shape=jax.ShapeDtypeStruct((B, Lq_pad, d_v), out_dtype),
            grid=(B, Lq_pad // tq),
            in_specs=[pl.BlockSpec((1, tq, E), lambda b, t: (b, t, 0)),
                      pl.BlockSpec((1, E, m), lambda b, t: (b, 0, 0)),
                      pl.BlockSpec((1, 1, m), lambda b, t: (b, 0, 0)),
                      pl.BlockSpec((1, m, d_v), lambda b, t: (b, 0, 0))],
            out_specs=pl.BlockSpec((1, tq, d_v), lambda b, t: (b, t, 0)),
            compiler_params=cparams_b,
        )(xq_pad.astype(cdt), bmat.astype(cdt), c2, right.astype(cdt))

    # nn.Dropout(0.1) is identity at inference; the Conv2d branch output is discarded
    # by the reference forward (conv_kernel_size=None), so it is skipped.
    # TODO(synk): when running one instance per head, batch heads into the wv/right lane
    # dimension so the output last dim reaches >=128 (avoids masked vst.msk stores).
    return out_pad[:, :Lq]


# ---------------------------------------------------------------------------
# Pure-JAX reference (mirrors the PyTorch forward) for correctness checks
# ---------------------------------------------------------------------------
def reference(query_in, key_in, value_in, params, *, d_k, num_landmarks):
    """Also returns a conditioning factor: rounding upstream of pinverse(kernel_2) is
    amplified by ~||pinv||_inf in the output, so test tolerances are scaled by it."""
    B, Lq, E = query_in.shape
    Lk = key_in.shape[1]
    m = num_landmarks
    while Lk % m != 0 and m > 1:
        m -= 1
    seg = Lk // m
    scaling = 1.0 / math.sqrt(math.sqrt(d_k))
    q = (jnp.einsum("ble,ed->bld", query_in, params["wq"], **_HP) + params["bq"]) * scaling
    k = (jnp.einsum("ble,ed->bld", key_in, params["wk"], **_HP) + params["bk"]) * scaling
    v = jnp.einsum("ble,ed->bld", value_in, params["wv"], **_HP) + params["bv"]
    k_land = k.reshape(B, m, seg, -1).mean(axis=2)
    q_land = q.reshape(B, m, seg, -1).mean(axis=2)
    k1 = jax.nn.softmax(jnp.einsum("bld,bmd->blm", q, k_land, **_HP), axis=-1)
    k2 = jax.nn.softmax(jnp.einsum("bnd,bmd->bnm", q_land, k_land, **_HP), axis=-1)
    k3 = jax.nn.softmax(jnp.einsum("bnd,bld->bnl", q_land, k, **_HP), axis=-1)
    with jax.default_matmul_precision("float32"):
        k2_inv = jnp.linalg.pinv(k2)
    left = jnp.einsum("blm,bmn->bln", k1, k2_inv, **_HP)
    k3v = jnp.einsum("bnl,bld->bnd", k3, v, **_HP)
    out = jnp.einsum("bln,bnd->bld", left, k3v, **_HP)
    amp = 1.0 + float(jnp.max(jnp.sum(jnp.abs(k2_inv), axis=-1)))
    return out, amp


def _make_params(key, E, d_k, d_v):
    ks = jax.random.split(key, 6)
    bound = 1.0 / math.sqrt(E)
    u = lambda k, shape: jax.random.uniform(k, shape, jnp.float32, -bound, bound)
    return {"wq": u(ks[0], (E, d_k)), "bq": u(ks[1], (1, d_k)),
            "wk": u(ks[2], (E, d_k)), "bk": u(ks[3], (1, d_k)),
            "wv": u(ks[4], (E, d_v)), "bv": u(ks[5], (1, d_v))}


def _check(name, out, ref, amp, base_tol):
    assert out.shape == ref.shape, f"{name}: shape {out.shape} vs {ref.shape}"
    assert bool(jnp.all(jnp.isfinite(out))), f"{name}: non-finite output"
    atol = base_tol * amp
    ok = jnp.allclose(out, ref, atol=atol, rtol=base_tol)
    assert bool(ok), (f"{name}: mismatch, max abs diff "
                      f"{float(jnp.max(jnp.abs(out - ref))):.3e} (atol={atol:.3e})")


if __name__ == "__main__":
    B, L, E = 2, 16, 32
    d_k = d_v = 16
    num_landmarks = 4

    root = jax.random.PRNGKey(0)
    kp, kx, kq, kk, kv, kx1, kp2, kx2 = jax.random.split(root, 8)
    params = _make_params(kp, E, d_k, d_v)

    # 1) self-attention (query is key is value): fused single-pass path, f32 parity.
    x = 3.0 * jax.random.normal(kx, (B, L, E), jnp.float32)
    ref, amp = reference(x, x, x, params, d_k=d_k, num_landmarks=num_landmarks)
    out = nystrom_self_attention(x, x, x, params, d_k=d_k, num_landmarks=num_landmarks,
                                 compute_dtype=jnp.float32)
    out = jax.block_until_ready(out)
    _check("self-attn/f32", out, ref, amp, 2e-3)

    # 2) distinct query/key/value tensors: split-input path, f32 parity.
    q_in = 3.0 * jax.random.normal(kq, (B, L, E), jnp.float32)
    k_in = 3.0 * jax.random.normal(kk, (B, L, E), jnp.float32)
    v_in = 3.0 * jax.random.normal(kv, (B, L, E), jnp.float32)
    ref, amp = reference(q_in, k_in, v_in, params, d_k=d_k, num_landmarks=num_landmarks)
    out = jax.block_until_ready(
        nystrom_self_attention(q_in, k_in, v_in, params, d_k=d_k,
                               num_landmarks=num_landmarks, compute_dtype=jnp.float32))
    _check("cross-attn/f32", out, ref, amp, 2e-3)

    # 3) batch=1, awkward L=24, forced 16-row tiles: exercises host padding + in-kernel
    #    masking and the 2-way Lk reduction split (>=2-wide parallel extent for v7x).
    x1 = 3.0 * jax.random.normal(kx1, (1, 24, E), jnp.float32)
    ref, amp = reference(x1, x1, x1, params, d_k=d_k, num_landmarks=num_landmarks)
    out = jax.block_until_ready(
        nystrom_self_attention(x1, x1, x1, params, d_k=d_k,
                               num_landmarks=num_landmarks, compute_dtype=jnp.float32,
                               max_seq_tile=16))
    _check("pad+split/f32", out, ref, amp, 2e-3)

    # 4) m > d_k: exercises the unfolded (two-matmul) kernel_3 form.
    params2 = _make_params(kp2, E, 4, d_v)
    x2 = 3.0 * jax.random.normal(kx2, (B, L, E), jnp.float32)
    ref, amp = reference(x2, x2, x2, params2, d_k=4, num_landmarks=8)
    out = jax.block_until_ready(
        nystrom_self_attention(x2, x2, x2, params2, d_k=4, num_landmarks=8,
                               compute_dtype=jnp.float32))
    _check("unfolded/f32", out, ref, amp, 2e-3)

    # 5) default bf16 streams / MXU operands (production perf config): shape/finiteness
    #    plus a loose sanity bound only -- bf16 rounding amplified through pinverse(k2)
    #    is intrinsically larger than tight f32 parity.
    ref, amp = reference(x, x, x, params, d_k=d_k, num_landmarks=num_landmarks)
    out_bf16 = jax.block_until_ready(
        nystrom_self_attention(x, x, x, params, d_k=d_k, num_landmarks=num_landmarks))
    assert out_bf16.shape == ref.shape, "bf16 path shape mismatch"
    assert bool(jnp.all(jnp.isfinite(out_bf16))), "bf16 path produced non-finite values"
    assert float(jnp.max(jnp.abs(out_bf16 - ref))) < 0.05 * amp * (
        1.0 + float(jnp.max(jnp.abs(ref)))), "bf16 path diverged from reference"

    print("KERNEL_OK")
</pallas_src>

<mosaic_0001>
module attributes {stable_mosaic.version = 11 : i64} {
  func.func @kernel(%arg0: i32, %arg1: i32, %arg2: i32, %arg3: memref<1x16x32xf32, #tpu.memory_space<vmem>>, %arg4: memref<1x32x20xf32, #tpu.memory_space<vmem>>, %arg5: memref<1x1x20xf32, #tpu.memory_space<vmem>>, %arg6: memref<1x32x4xf32, #tpu.memory_space<vmem>>, %arg7: memref<1x1x4xf32, #tpu.memory_space<vmem>>, %arg8: memref<1x16x4xf32, #tpu.memory_space<vmem>>, %arg9: memref<1x1x16x4xf32, #tpu.memory_space<vmem>>, %arg10: memref<1x1x1x4xf32, #tpu.memory_space<vmem>>, %arg11: memref<1x1x1x4xf32, #tpu.memory_space<vmem>>, %arg12: memref<1x4xf32, #tpu.memory_space<vmem>>, %arg13: memref<1x4xf32, #tpu.memory_space<vmem>>, %arg14: memref<16x4xf32, #tpu.memory_space<vmem>>) attributes {dimension_semantics = [#tpu.dimension_semantics<parallel>, #tpu.dimension_semantics<parallel>, #tpu.dimension_semantics<arbitrary>], iteration_bounds = array<i64: 2, 1, 1>, scalar_prefetch = 0 : i64, scratch_operands = 3 : i64, tpu.core_type = #tpu.core_type<tc>, window_params = [{transform_indices = @transform_0, window_bounds = array<i64: 1, 16, 32>}, {transform_indices = @transform_1, window_bounds = array<i64: 1, 32, 20>}, {transform_indices = @transform_2, window_bounds = array<i64: 1, 1, 20>}, {transform_indices = @transform_3, window_bounds = array<i64: 1, 32, 4>}, {transform_indices = @transform_4, window_bounds = array<i64: 1, 1, 4>}, {transform_indices = @transform_5, window_bounds = array<i64: 1, 16, 4>}, {transform_indices = @transform_6, window_bounds = array<i64: 1, 1, 16, 4>}, {transform_indices = @transform_7, window_bounds = array<i64: 1, 1, 1, 4>}, {transform_indices = @transform_8, window_bounds = array<i64: 1, 1, 1, 4>}]} {
    %c0_i32 = arith.constant 0 : i32
    %0 = arith.cmpi eq, %arg2, %c0_i32 : i32
    %1 = arith.extui %0 : i1 to i32
    %c0_i32_0 = arith.constant 0 : i32
    %2 = arith.cmpi ne, %1, %c0_i32_0 : i32
    scf.if %2 {
      %cst_39 = arith.constant -1.000000e+30 : f32
      %60 = vector.broadcast %cst_39 : f32 to vector<1x4xf32>
      %c0_40 = arith.constant 0 : index
      %c0_41 = arith.constant 0 : index
      %61 = vector.load %arg12[%c0_40, %c0_41] : memref<1x4xf32, #tpu.memory_space<vmem>>, vector<1x4xf32>
      tpu.vector_store %arg12[%c0_40, %c0_41], %60 {strides = array<i32>} : memref<1x4xf32, #tpu.memory_space<vmem>>, vector<1x4xf32>,
      %cst_42 = arith.constant 0.000000e+00 : f32
      %62 = vector.broadcast %cst_42 : f32 to vector<1x4xf32>
      %c0_43 = arith.constant 0 : index
      %c0_44 = arith.constant 0 : index
      %63 = vector.load %arg13[%c0_43, %c0_44] : memref<1x4xf32, #tpu.memory_space<vmem>>, vector<1x4xf32>
      tpu.vector_store %arg13[%c0_43, %c0_44], %62 {strides = array<i32>} : memref<1x4xf32, #tpu.memory_space<vmem>>, vector<1x4xf32>,
      %cst_45 = arith.constant 0.000000e+00 : f32
      %64 = vector.broadcast %cst_45 : f32 to vector<16x4xf32>
      %c0_46 = arith.constant 0 : index
      %c0_47 = arith.constant 0 : index
      %65 = vector.load %arg14[%c0_46, %c0_47] : memref<16x4xf32, #tpu.memory_space<vmem>>, vector<16x4xf32>
      tpu.vector_store %arg14[%c0_46, %c0_47], %64 {strides = array<i32>} : memref<16x4xf32, #tpu.memory_space<vmem>>, vector<16x4xf32>,
    } else {
    }
    %c0 = arith.constant 0 : index
    %c0_1 = arith.constant 0 : index
    %c0_2 = arith.constant 0 : index
    %3 = vector.load %arg3[%c0, %c0_1, %c0_2] : memref<1x16x32xf32, #tpu.memory_space<vmem>>, vector<1x16x32xf32>
    %4 = vector.shape_cast %3 : vector<1x16x32xf32> to vector<16x32xf32>
    %c0_3 = arith.constant 0 : index
    %c0_4 = arith.constant 0 : index
    %c0_5 = arith.constant 0 : index
    %5 = vector.load %arg4[%c0_3, %c0_4, %c0_5] : memref<1x32x20xf32, #tpu.memory_space<vmem>>, vector<1x32x20xf32>
    %6 = vector.shape_cast %5 : vector<1x32x20xf32> to vector<32x20xf32>
    %cst = arith.constant dense<0.000000e+00> : vector<16x20xf32>
    %7 = tpu.matmul %4, %6, %cst {dimension_numbers = #tpu.dot_dimension_numbers<[1], [0], [0], [1], [0, 0, 1, 1], [], []>} : vector<16x32xf32>, vector<32x20xf32>, vector<16x20xf32> -> vector<16x20xf32>
    %c0_6 = arith.constant 0 : index
    %c0_7 = arith.constant 0 : index
    %c0_8 = arith.constant 0 : index
    %8 = vector.load %arg5[%c0_6, %c0_7, %c0_8] : memref<1x1x20xf32, #tpu.memory_space<vmem>>, vector<1x1x20xf32>
    %9 = vector.shape_cast %8 : vector<1x1x20xf32> to vector<1x20xf32>
    %10 = vector.broadcast %9 : vector<1x20xf32> to vector<16x20xf32>
    %11 = arith.addf %7, %10 : vector<16x20xf32>
    %12 = vector.extract_strided_slice %11 {offsets = [0, 0], sizes = [16, 16], strides = [1, 1]} : vector<16x20xf32> to vector<16x16xf32>
    %13 = vector.extract_strided_slice %11 {offsets = [0, 16], sizes = [16, 4], strides = [1, 1]} : vector<16x20xf32> to vector<16x4xf32>
    %cst_9 = arith.constant dense<0xFF800000> : vector<16xf32>
    %14 = vector.multi_reduction <maximumf>, %13, %cst_9 [1] : vector<16x4xf32> to vector<16xf32>
    %15 = vector.shape_cast %14 : vector<16xf32> to vector<16x1xf32>
    %16 = vector.broadcast %15 : vector<16x1xf32> to vector<16x4xf32>
    %17 = arith.subf %13, %16 : vector<16x4xf32>
    %18 = math.exp %17 : vector<16x4xf32>
    %cst_10 = arith.constant dense<0.000000e+00> : vector<16xf32>
    %19 = vector.multi_reduction <add>, %18, %cst_10 [1] : vector<16x4xf32> to vector<16xf32>
    %20 = vector.shape_cast %19 : vector<16xf32> to vector<16x1xf32>
    %cst_11 = arith.constant 1.000000e+00 : f32
    %21 = vector.broadcast %cst_11 : f32 to vector<16x1xf32>
    %22 = arith.divf %21, %20 : vector<16x1xf32>
    %23 = vector.broadcast %22 : vector<16x1xf32> to vector<16x4xf32>
    %24 = arith.mulf %18, %23 : vector<16x4xf32>
    %c0_12 = arith.constant 0 : index
    %c0_13 = arith.constant 0 : index
    %c0_14 = arith.constant 0 : index
    %25 = vector.load %arg8[%c0_12, %c0_13, %c0_14] : memref<1x16x4xf32, #tpu.memory_space<vmem>>, vector<1x16x4xf32>
    %26 = vector.shape_cast %25 : vector<1x16x4xf32> to vector<16x4xf32>
    %27 = vector.shape_cast %24 : vector<16x4xf32> to vector<1x16x4xf32>
    tpu.vector_store %arg8[%c0_12, %c0_13, %c0_14], %27 {strides = array<i32>} : memref<1x16x4xf32, #tpu.memory_space<vmem>>, vector<1x16x4xf32>,
    %c0_15 = arith.constant 0 : index
    %c0_16 = arith.constant 0 : index
    %c0_17 = arith.constant 0 : index
    %28 = vector.load %arg6[%c0_15, %c0_16, %c0_17] : memref<1x32x4xf32, #tpu.memory_space<vmem>>, vector<1x32x4xf32>
    %29 = vector.shape_cast %28 : vector<1x32x4xf32> to vector<32x4xf32>
    %cst_18 = arith.constant dense<0.000000e+00> : vector<16x4xf32>
    %30 = tpu.matmul %4, %29, %cst_18 {dimension_numbers = #tpu.dot_dimension_numbers<[1], [0], [0], [1], [0, 0, 1, 1], [], []>} : vector<16x32xf32>, vector<32x4xf32>, vector<16x4xf32> -> vector<16x4xf32>
    %c0_19 = arith.constant 0 : index
    %c0_20 = arith.constant 0 : index
    %c0_21 = arith.constant 0 : index
    %31 = vector.load %arg7[%c0_19, %c0_20, %c0_21] : memref<1x1x4xf32, #tpu.memory_space<vmem>>, vector<1x1x4xf32>
    %32 = vector.shape_cast %31 : vector<1x1x4xf32> to vector<1x4xf32>
    %33 = vector.broadcast %32 : vector<1x4xf32> to vector<16x4xf32>
    %34 = arith.addf %30, %33 : vector<16x4xf32>
    %c0_22 = arith.constant 0 : index
    %c0_23 = arith.constant 0 : index
    %35 = vector.load %arg12[%c0_22, %c0_23] : memref<1x4xf32, #tpu.memory_space<vmem>>, vector<1x4xf32>
    %cst_24 = arith.constant dense<0xFF800000> : vector<4xf32>
    %36 = vector.multi_reduction <maximumf>, %34, %cst_24 [0] : vector<16x4xf32> to vector<4xf32>
    %37 = vector.shape_cast %36 : vector<4xf32> to vector<1x4xf32>
    %38 = arith.maximumf %35, %37 : vector<1x4xf32>
    %39 = arith.subf %35, %38 : vector<1x4xf32>
    %40 = math.exp %39 : vector<1x4xf32>
    %41 = vector.broadcast %38 : vector<1x4xf32> to vector<16x4xf32>
    %42 = arith.subf %34, %41 : vector<16x4xf32>
    %43 = math.exp %42 : vector<16x4xf32>
    %c0_25 = arith.constant 0 : index
    %c0_26 = arith.constant 0 : index
    %44 = vector.load %arg13[%c0_25, %c0_26] : memref<1x4xf32, #tpu.memory_space<vmem>>, vector<1x4xf32>
    %45 = arith.mulf %40, %44 : vector<1x4xf32>
    %cst_27 = arith.constant dense<0.000000e+00> : vector<4xf32>
    %46 = vector.multi_reduction <add>, %43, %cst_27 [0] : vector<16x4xf32> to vector<4xf32>
    %47 = vector.shape_cast %46 : vector<4xf32> to vector<1x4xf32>
    %48 = arith.addf %45, %47 : vector<1x4xf32>
    %c0_28 = arith.constant 0 : index
    %c0_29 = arith.constant 0 : index
    %49 = vector.load %arg13[%c0_28, %c0_29] : memref<1x4xf32, #tpu.memory_space<vmem>>, vector<1x4xf32>
    tpu.vector_store %arg13[%c0_28, %c0_29], %48 {strides = array<i32>} : memref<1x4xf32, #tpu.memory_space<vmem>>, vector<1x4xf32>,
    %c0_30 = arith.constant 0 : index
    %c0_31 = arith.constant 0 : index
    %50 = vector.load %arg14[%c0_30, %c0_31] : memref<16x4xf32, #tpu.memory_space<vmem>>, vector<16x4xf32>
    %51 = vector.broadcast %40 : vector<1x4xf32> to vector<16x4xf32>
    %52 = arith.mulf %51, %50 : vector<16x4xf32>
    %cst_32 = arith.constant dense<0.000000e+00> : vector<16x4xf32>
    %53 = tpu.matmul %12, %43, %cst_32 {dimension_numbers = #tpu.dot_dimension_numbers<[0], [0], [1], [1], [0, 1, 1, 1], [], []>} : vector<16x16xf32>, vector<16x4xf32>, vector<16x4xf32> -> vector<16x4xf32>
    %54 = arith.addf %52, %53 : vector<16x4xf32>
    %c0_33 = arith.constant 0 : index
    %c0_34 = arith.constant 0 : index
    %55 = vector.load %arg14[%c0_33, %c0_34] : memref<16x4xf32, #tpu.memory_space<vmem>>, vector<16x4xf32>
    tpu.vector_store %arg14[%c0_33, %c0_34], %54 {strides = array<i32>} : memref<16x4xf32, #tpu.memory_space<vmem>>, vector<16x4xf32>,
    %c0_35 = arith.constant 0 : index
    %c0_36 = arith.constant 0 : index
    %56 = vector.load %arg12[%c0_35, %c0_36] : memref<1x4xf32, #tpu.memory_space<vmem>>, vector<1x4xf32>
    tpu.vector_store %arg12[%c0_35, %c0_36], %38 {strides = array<i32>} : memref<1x4xf32, #tpu.memory_space<vmem>>, vector<1x4xf32>,
    %c0_i32_37 = arith.constant 0 : i32
    %57 = arith.cmpi eq, %arg2, %c0_i32_37 : i32
    %58 = arith.extui %57 : i1 to i32
    %c0_i32_38 = arith.constant 0 : i32
    %59 = arith.cmpi ne, %58, %c0_i32_38 : i32
    scf.if %59 {
      %c0_39 = arith.constant 0 : index
      %c0_40 = arith.constant 0 : index
      %60 = vector.load %arg14[%c0_39, %c0_40] : memref<16x4xf32, #tpu.memory_space<vmem>>, vector<16x4xf32>
      %c0_41 = arith.constant 0 : index
      %c0_42 = arith.constant 0 : index
      %c0_43 = arith.constant 0 : index
      %c0_44 = arith.constant 0 : index
      %61 = vector.load %arg9[%c0_41, %c0_42, %c0_43, %c0_44] : memref<1x1x16x4xf32, #tpu.memory_space<vmem>>, vector<1x1x16x4xf32>
      %62 = vector.shape_cast %61 : vector<1x1x16x4xf32> to vector<16x4xf32>
      %63 = vector.shape_cast %60 : vector<16x4xf32> to vector<1x1x16x4xf32>
      tpu.vector_store %arg9[%c0_41, %c0_42, %c0_43, %c0_44], %63 {strides = array<i32>} : memref<1x1x16x4xf32, #tpu.memory_space<vmem>>, vector<1x1x16x4xf32>,
      %c0_45 = arith.constant 0 : index
      %c0_46 = arith.constant 0 : index
      %64 = vector.load %arg13[%c0_45, %c0_46] : memref<1x4xf32, #tpu.memory_space<vmem>>, vector<1x4xf32>
      %c0_47 = arith.constant 0 : index
      %c0_48 = arith.constant 0 : index
      %c0_49 = arith.constant 0 : index
      %c0_50 = arith.constant 0 : index
      %65 = vector.load %arg10[%c0_47, %c0_48, %c0_49, %c0_50] : memref<1x1x1x4xf32, #tpu.memory_space<vmem>>, vector<1x1x1x4xf32>
      %66 = vector.shape_cast %65 : vector<1x1x1x4xf32> to vector<1x4xf32>
      %67 = vector.shape_cast %64 : vector<1x4xf32> to vector<1x1x1x4xf32>
      tpu.vector_store %arg10[%c0_47, %c0_48, %c0_49, %c0_50], %67 {strides = array<i32>} : memref<1x1x1x4xf32, #tpu.memory_space<vmem>>, vector<1x1x1x4xf32>,
      %c0_51 = arith.constant 0 : index
      %c0_52 = arith.constant 0 : index
      %68 = vector.load %arg12[%c0_51, %c0_52] : memref<1x4xf32, #tpu.memory_space<vmem>>, vector<1x4xf32>
      %c0_53 = arith.constant 0 : index
      %c0_54 = arith.constant 0 : index
      %c0_55 = arith.constant 0 : index
      %c0_56 = arith.constant 0 : index
      %69 = vector.load %arg11[%c0_53, %c0_54, %c0_55, %c0_56] : memref<1x1x1x4xf32, #tpu.memory_space<vmem>>, vector<1x1x1x4xf32>
      %70 = vector.shape_cast %69 : vector<1x1x1x4xf32> to vector<1x4xf32>
      %71 = vector.shape_cast %68 : vector<1x4xf32> to vector<1x1x1x4xf32>
      tpu.vector_store %arg11[%c0_53, %c0_54, %c0_55, %c0_56], %71 {strides = array<i32>} : memref<1x1x1x4xf32, #tpu.memory_space<vmem>>, vector<1x1x1x4xf32>,
    } else {
    }
    return
  }
  func.func @transform_0(%arg0: i32, %arg1: i32, %arg2: i32) -> (i32, i32, i32) {
    %c1_i32 = arith.constant 1 : i32
    %0 = arith.muli %arg1, %c1_i32 : i32
    %1 = arith.addi %0, %arg2 : i32
    %c0_i32 = arith.constant 0 : i32
    %c0_i32_0 = arith.constant 0 : i32
    return %arg0, %1, %c0_i32 : i32, i32, i32
  }
  func.func @transform_1(%arg0: i32, %arg1: i32, %arg2: i32) -> (i32, i32, i32) {
    %c0_i32 = arith.constant 0 : i32
    %c0_i32_0 = arith.constant 0 : i32
    %c0_i32_1 = arith.constant 0 : i32
    return %arg0, %c0_i32, %c0_i32_0 : i32, i32, i32
  }
  func.func @transform_2(%arg0: i32, %arg1: i32, %arg2: i32) -> (i32, i32, i32) {
    %c0_i32 = arith.constant 0 : i32
    %c0_i32_0 = arith.constant 0 : i32
    %c0_i32_1 = arith.constant 0 : i32
    return %arg0, %c0_i32, %c0_i32_0 : i32, i32, i32
  }
  func.func @transform_3(%arg0: i32, %arg1: i32, %arg2: i32) -> (i32, i32, i32) {
    %c0_i32 = arith.constant 0 : i32
    %c0_i32_0 = arith.constant 0 : i32
    %c0_i32_1 = arith.constant 0 : i32
    return %arg0, %c0_i32, %c0_i32_0 : i32, i32, i32
  }
  func.func @transform_4(%arg0: i32, %arg1: i32, %arg2: i32) -> (i32, i32, i32) {
    %c0_i32 = arith.constant 0 : i32
    %c0_i32_0 = arith.constant 0 : i32
    %c0_i32_1 = arith.constant 0 : i32
    return %arg0, %c0_i32, %c0_i32_0 : i32, i32, i32
  }
  func.func @transform_5(%arg0: i32, %arg1: i32, %arg2: i32) -> (i32, i32, i32) {
    %c1_i32 = arith.constant 1 : i32
    %0 = arith.muli %arg1, %c1_i32 : i32
    %1 = arith.addi %0, %arg2 : i32
    %c0_i32 = arith.constant 0 : i32
    %c0_i32_0 = arith.constant 0 : i32
    return %arg0, %1, %c0_i32 : i32, i32, i32
  }
  func.func @transform_6(%arg0: i32, %arg1: i32, %arg2: i32) -> (i32, i32, i32, i32) {
    %c0_i32 = arith.constant 0 : i32
    %c0_i32_0 = arith.constant 0 : i32
    %c0_i32_1 = arith.constant 0 : i32
    return %arg0, %arg1, %c0_i32, %c0_i32_0 : i32, i32, i32, i32
  }
  func.func @transform_7(%arg0: i32, %arg1: i32, %arg2: i32) -> (i32, i32, i32, i32) {
    %c0_i32 = arith.constant 0 : i32
    %c0_i32_0 = arith.constant 0 : i32
    %c0_i32_1 = arith.constant 0 : i32
    return %arg0, %arg1, %c0_i32, %c0_i32_0 : i32, i32, i32, i32
  }
  func.func @transform_8(%arg0: i32, %arg1: i32, %arg2: i32) -> (i32, i32, i32, i32) {
    %c0_i32 = arith.constant 0 : i32
    %c0_i32_0 = arith.constant 0 : i32
    %c0_i32_1 = arith.constant 0 : i32
    return %arg0, %arg1, %c0_i32, %c0_i32_0 : i32, i32, i32, i32
  }
}

</mosaic_0001>

<bundles_post_ra>
// kernel: tpu_custom_call.1
= control target key start
LH: loop header
LB: loop body
LE: loop exit
PB: predicated region body
PF: predicated region fallthrough
CT: control target
= control target key end

     0   :  { %s1724_s0 = inlined_call_operand.vmem [shape: f32[2,16,32], index: 0, kind: input, shape index: {}]   ;;  %s1725_s1 = inlined_call_operand.vmem [shape: f32[2,32,20], index: 1, kind: input, shape index: {}]   ;;  %s1726_s2 = inlined_call_operand.vmem [shape: f32[2,1,20], index: 2, kind: input, shape index: {}]   ;;  %s1727_s3 = inlined_call_operand.vmem [shape: f32[2,32,4], index: 3, kind: input, shape index: {}]   ;;  %s1728_s4 = inlined_call_operand.vmem [shape: f32[2,1,4], index: 4, kind: input, shape index: {}]   ;;  %s1729_s5 = inlined_call_operand.vmem [shape: f32[2,16,4], index: 5, kind: output, shape index: {0}]   ;;  %s1730_s6 = inlined_call_operand.vmem [shape: f32[2,1,16,4], index: 6, kind: output, shape index: {1}]   ;;  %s1731_s7 = inlined_call_operand.hbm [shape: f32[2,1,1,4], index: 7, kind: output, shape index: {2}]   ;;  %s1732_s8 = inlined_call_operand.hbm [shape: f32[2,1,1,4], index: 8, kind: output, shape index: {3}]  }
   0x1   :  { %1737 = sst [smem:[#allocation11_spill]] %s1724_s0 }
   0x2   :  { %1738 = sst [smem:[#allocation12_spill]] %s1725_s1 }
   0x3   :  { %1739 = sst [smem:[#allocation13_spill]] %s1726_s2 }
   0x4   :  { %1740 = sst [smem:[#allocation14_spill]] %s1727_s3 }
   0x5   :  { %14 = vsyncpa [#allocation6], 0 }
   0x6   :  { %16 = vsyncpa [#allocation6 + $0x1], 0 }
   0x7   :  { %17 = vsyncpa [#allocation8], 0 }
   0x8   :  { %19 = vsyncpa [#allocation8 + $0x1], 0  ;;  %s1510_s27 = smov 0   ;;  %s1512_s28 = smov 0  }
   0x9   :  { %s1514_s29 = smov 0   ;;  %s1516_s30 = smov 0  }
   0xa   :  { %s1518_s9 = smov 0   ;;  %s1520_s10 = smov 0  }
   0xb LB: > { %s1174_s11 = sadd.s32 4294967295, %s1458_s10   ;;  %s1175_s12 = sadd.s32 4294967294, %s1458_s10   ;;  %s1458_s10 = sphi %s1520_s10, %s25_s10   ;;  %s1454_s9 = sphi %s1518_s9, %s1754_s9   ;;  %s1450_s30 = sphi %s1516_s30, %s1753_s30   ;;  %s1446_s29 = sphi %s1514_s29, %s1752_s29   ;;  %s1442_s28 = sphi %s1512_s28, %s1751_s28   ;;  %s1438_s27 = sphi %s1510_s27, %s1750_s27  }
   0xc   : > { %s44_s13 = sadd.s32 1, %s1454_s9  ;;  %s245_s14 = sadd.s32 1, %s1446_s29 }
   0xd   : > { %p46_p0 = scmp.ge.s32.totalorder %s44_s13, 2  ;;  %p255_p1 = scmp.ne.s32.totalorder %s1446_s29, %s1442_s28 }
   0xe   : > { %p256_p2 = scmp.eq.s32.totalorder %s1174_s11, 1  ;;  %p261_p3 = scmp.ne.s32.totalorder %s1442_s28, %s1438_s27 }
   0xf   : > { %s1756_s13 = smov (%p46_p0, %s44_s13), 0  ;;  %p262_p5 = scmp.eq.s32.totalorder %s1175_s12, 1 }
  0x10   : > { %p1550_p4 = por %p256_p2, %p255_p1  ;;  %s240_s16 = ssub.s32 %s1454_s9, %s1756_s13 }
  0x11   : > { %p1178_p6 = scmp.ge.s32.totalorder %s1458_s10, 1  ;;  %p243_p7 = scmp.eq.s32.totalorder %s240_s16, 0 }
  0x12   : > { %p1557_p8 = por %p262_p5, %p261_p3  ;;  %p351_p9 = scmp.lt.s32.totalorder %s1458_s10, 3 }
  0x13   : > { %s1563_s18 = scalar_select %p243_p7, %s1446_s29, %s245_s14  }
  0x14   : > { %p352_p10 = pnand %p1178_p6, %p351_p9 }
  0x15   : > { %p430_p11 = scmp.lt.s32.totalorder (!%p352_p10), %s1450_s30, 1  ;;  %s1743_s1 = sld [smem:[#allocation12_spill]] (!%p352_p10)  ;;  %vm500_vm0 = vcmask (!%p352_p10), 261120   ;;  %vm481_vm1 = vcmask (!%p352_p10), 24576   ;;  %v1460_v14 = vmov (!%p352_p10), -1e+30   ;;  %v727_v32 = vlaneseq (!%p352_p10) }
  0x16   : > { %355 = sbr.rel (%p352_p10) target bundleno = 837 (0x345), region = 40  ;;  %s1744_s0 = sld [smem:[#allocation11_spill]] (!%p352_p10)  ;;  %482 = vst.msk [vmem:[#allocation2] sm:$0x1] (!%p352_p10), %vm481_vm1, %v1460_v14  ;;  %vm582_vm2 = vcmask (!%p352_p10), 162944   ;;  %vm484_vm3 = vcmask (!%p352_p10), 31744  }
  0x17   : > { %s1745_s3 = sld [smem:[#allocation14_spill]] (!%p352_p10)  ;;  %s1746_s2 = sld [smem:[#allocation13_spill]] (!%p352_p10)  ;;  %v1598_v35 = vshrl.u32 (!%p352_p10), %v727_v32, 7  ;;  %vm794_vm4 = vcmask (!%p352_p10), 130048  }
  0x19   : > { %v729_v39 = vsub.s32 (!%p352_p10), 0, %v1598_v35 }
  0x1d   : > { %s1567_s19 = scalar_select %p430_p11, %s1450_s30, 1  ;;  %v712_v37 = vld [vmem:[#allocation2] sm:$0x1] }
  0x1f   : > { %s1202_s20 = sshll.u32 %s1567_s19, 5  ;;  %s1571_s21 = sshll.u32 %s1567_s19, 4 }
  0x20   : > { %s444_s24 = scalar_lea.vmem %s1743_s1, %s1202_s20  ;;  %s437_s11 = scalar_lea.vmem %s1744_s0, %s1571_s21 }
  0x21   : > { %v489_v0 = vld [vmem:[%s444_s24] sm:$0xff]  ;;  %v490_v1 = vld [vmem:[%s444_s24 + $0x8] sm:$0xff]  ;;  %v491_v2 = vld [vmem:[%s444_s24 + $0x10] sm:$0xff]  ;;  %s452_s16 = scalar_lea.vmem %s1745_s3, %s1202_s20  ;;  %s447_s23 = scalar_lea.vmem %s1746_s2, %s1567_s19 }
  0x22   : > { %v1251_v3 = vpack.c.bf16 %v490_v1, %v489_v0  ;;  %v492_v4 = vld [vmem:[%s444_s24 + $0x18] sm:$0xff]  ;;  %v487_v5 = vld [vmem:[%s437_s11] sm:$0xff]  ;;  %v627_v8 = vld [vmem:[%s452_s16 + $0x8] sm:$0xff]  ;;  %s455_s26 = scalar_lea.vmem %s1728_s4, %s1567_s19  ;;  %s1733_s19 = smov 112  }
  0x23   : > { %v1255_v6 = vpack.c.bf16 %v492_v4, %v491_v2  ;;  %1230 = vmatprep.mubr.msk.f32.mxu0 %vm500_vm0, %v487_v5  ;;  %v626_v7 = vld [vmem:[%s452_s16] sm:$0xff]  ;;  %v628_v9 = vld [vmem:[%s452_s16 + $0x10] sm:$0xff]  ;;  %1241 = vmatprep.mubr.msk.f32.mxu1 %vm500_vm0, %v487_v5  ;;  %v629_v11 = vld [vmem:[%s452_s16 + $0x18] sm:$0xff]  ;;  %v1461_v2 = vmov 0.0   ;;  %s476_s22 = scalar_lea.vmem %s1730_s6, %s1571_s21 }
  0x24   : > { %1252 = vmatprep.subr.bf16.mxu0 %v1251_v3  ;;  %v1259_v10 = vpack.c.bf16 %v627_v8, %v626_v7  ;;  %v1263_v12 = vpack.c.bf16 %v629_v11, %v628_v9  ;;  %v488_v13 = vld [vmem:[%s437_s11 + $0x8] sm:$0xff]  ;;  %v1189_v15 = vld [vmem:[%s447_s23] ss:$0 sm:$0xff]  ;;  %483 = vst.msk [vmem:[#allocation3] sm:$0x1] %vm481_vm1, %v1461_v2  ;;  %s1619_s11 = sand.u32 1, %s1442_s28  }
  0x25   : > { %1254 = vmatpush3.bf16.msra.mxu0 %v1251_v3  ;;  %v1192_v17 = vld [vmem:[%s455_s26] ss:$0 sm:$0xff]  ;;  %486 = vst.msk [vmem:[#allocation4 + $0x8] sm:$0xff] %vm484_vm3, %v1461_v2  ;;  %485 = vst.msk [vmem:[#allocation4] sm:$0xff] %vm484_vm3, %v1461_v2  ;;  %s1735_s12 = scalar_lea.vmem [#allocation7], %s1619_s11  ;;  %s421_s14 = scalar_lea.vmem [#allocation5], %s1619_s11 }
  0x26   : > { %1256 = vmatprep.subr.bf16.mxu0 %v1255_v6  ;;  %1260 = vmatprep.subr.bf16.mxu1 %v1259_v10  ;;  %s1736_s23 = sshll.u32 %s1450_s30, 4  ;;  %s937_s24 = sshll.u32 %s421_s14, 4  ;;  %s938_s24 = int_to_ptr.vmem [resolvable:$true] %s937_s24 }
  0x27   : > { %1262 = vmatpush3.bf16.msra.mxu1 %v1259_v10  ;;  %s912_s16 = scalar_lea.sflag [#allocation6], %s1619_s11  ;;  %s1348_s20 = scalar_lea.vmem %s938_s24, 16 }
  0x28   : > { %1264 = vmatprep.subr.bf16.mxu1 %v1263_v12  ;;  %p1349_p12 = scmp.ne.s32.totalorder %s938_s24, %s1348_s20 }
  0x29   : > { %1258 = vmatpush3.bf16.msra.mxu0 %v1255_v6 }
  0x2a   : > { %p1350_p13 = pnand %p1349_p12, %p1550_p4 }
  0x2b   : > { %1266 = vmatpush3.bf16.msra.mxu1 %v1263_v12  ;;  %v738_v7 = vld [vmem:[#allocation3] sm:$0x1] }
  0x2c   : > { %1231 = vmatmul.mubr.msk.f32.vlgmr.msra.gmra.mrb[0].mxu0 %vm500_vm0, %v488_v13  ;;  %p1351_p0 = pneg %p1350_p13 }
  0x2e   : > { %1242 = vmatmul.mubr.msk.f32.vlgmr.msra.gmra.mrb[0].mxu1 %vm500_vm0, %v488_v13 }
  0xff   : > { %v1232_v16 = vpop.f32.mrb[0].mxu0 }
 0x100   : > { %v573_v18 = vpop.f32.mrb[1].mxu0  ;;  %v579_v23 = vadd.f32 %v1232_v16, %v1189_v15 }
 0x101   : > { %v574_v19 = vadd.f32 %v1189_v15, %v573_v18  ;;  %v1243_v20 = vpop.f32.mrb[0].mxu1  ;;  %v753_v18 = vld [vmem:[#allocation4 + $0x8] sm:$0xff] }
 0x102   : > { %v709_v21 = vadd.f32 %v1243_v20, %v1192_v17  ;;  %v703_v22 = vpop.f32.mrb[1].mxu1  ;;  %v586_v29 = vsel %vm582_vm2, %v579_v23, -inf }
 0x103   : > { %762 = vxpose.xlu1.b32.start [1/2] (short) (narrow) %v574_v19, 16  ;;  %v583_v24 = vsel %vm582_vm2, %v574_v19, -inf  ;;  %v704_v25 = vadd.f32 %v1192_v17, %v703_v22 }
 0x104   : > { %584 = vmax.xlane.f32.xlu0 %v583_v24  ;;  %v714_v26 = vsel %vm484_vm3, %v709_v21, -inf }
 0x105   : > { %v713_v27 = vsel %vm484_vm3, %v704_v25, -inf }
 0x106   : > { %v715_v28 = vmax.f32 %v713_v27, %v714_v26 }
 0x107   : > { %763 = vxpose.xlu1.b32.end [2/2] (short) (narrow) %v579_v23, 16 }
 0x108   : > { %587 = vmax.xlane.f32.xlu0 %v586_v29  ;;  %v716_v30 = vrot.slane %v715_v28, 4 }
 0x10a   : > { %v717_v31 = vmax.f32 %v715_v28, %v716_v30 }
 0x10c   : > { %v718_v33 = vrot.slane %v717_v31, 2 }
 0x10e   : > { %v719_v34 = vmax.f32 %v717_v31, %v718_v33 }
 0x110   : > { %v720_v36 = vrot.slane %v719_v34, 1 }
 0x112   : > { %v721_v38 = vmax.f32 %v719_v34, %v720_v36 }
 0x114   : > { %v722_v40 = vmax.f32 %v712_v37, %v721_v38 }
 0x116   : > { %v723_v41 = vsub.f32 %v712_v37, %v722_v40  ;;  %v730_v42 = vrot.slane %v722_v40, %v729_v39  ;;  %880 = vst.msk [vmem:[#allocation2] sm:$0x1] %vm481_vm1, %v722_v40 }
 0x118   : > { %v732_v43 = vsub.f32 %v704_v25, %v730_v42  ;;  %v733_v44 = vsub.f32 %v709_v21, %v730_v42  ;;  %v724_v57 = vmul.f32 1.442695, %v723_v41 }
 0x11a   : > { %v734_v45 = vmul.f32 1.442695, %v732_v43  ;;  %v736_v46 = vmul.f32 1.442695, %v733_v44 }
 0x11c   : > { %1334 = vpow2.f32 %v734_v45 }
 0x11d   : > { %1336 = vpow2.f32 %v736_v46  ;;  %v890_v11 = vld [vmem:[#allocation2] sm:$0x1] }
 0x11e   : > { %1338 = vpow2.f32 %v724_v57  ;;  %891 = vst.msk [vmem:[%s1735_s12] sm:$0x1] %vm481_vm1, %v890_v11 }
 0x126   : > { %v1335_v47 = vpop.eup %1334 }
 0x127   : > { %v1337_v48 = vpop.eup %1336  ;;  %v740_v49 = vsel %vm484_vm3, %v1335_v47, 0.0 }
 0x128   : > { %v741_v50 = vsel %vm484_vm3, %v1337_v48, 0.0  ;;  %v1267_v51 = vpack.c.bf16 %v1337_v48, %v1335_v47  ;;  %v1339_v4 = vpop.eup %1338 }
 0x129   : > { %v742_v52 = vadd.f32 %v741_v50, %v740_v49  ;;  %v739_v8 = vmul.f32 %v1339_v4, %v738_v7  ;;  %v758_v17 = vrot.slane %v1339_v4, %v729_v39 }
 0x12a   : > { %1268 = vmatprep.subr.bf16.mxu0 %v1267_v51 }
 0x12b   : > { %1270 = vmatpush3.bf16.msra.mxu0 %v1267_v51  ;;  %v743_v55 = vrot.slane %v742_v52, 4  ;;  %v761_v20 = vmul.f32 %v758_v17, %v753_v18 }
 0x12d   : > { %v744_v56 = vadd.f32 %v743_v55, %v742_v52 }
 0x12f   : > { %v745_v60 = vrot.slane %v744_v56, 2 }
 0x131   : > { %v746_v0 = vadd.f32 %v745_v60, %v744_v56 }
 0x133   : > { %v747_v3 = vrot.slane %v746_v0, 1 }
 0x135   : > { %v748_v6 = vadd.f32 %v747_v3, %v746_v0 }
 0x137   : > { %v749_v10 = vadd.f32 %v748_v6, %v739_v8 }
 0x139   : > { %751 = vst.msk [vmem:[#allocation3] sm:$0x1] %vm481_vm1, %v749_v10 }
 0x140   : > { %v888_v12 = vld [vmem:[#allocation3] sm:$0x1] }
 0x141   : > { %889 = vst.msk [vmem:[%s421_s14] sm:$0x1] %vm481_vm1, %v888_v12 }
 0x183   : > { %v778_v53 = vpop.trf.xlu1 }
 0x184   : > { %1248 = vmatprep.mubr.msk.f32.mxu0 %vm794_vm4, %v778_v53 }
 0x187   : > { %v779_v54 = vpop.trf.xlu1 }
 0x188   : > { %1249 = vmatmul.mubr.msk.f32.vlgmr.msra.gmra.mrb[2].mxu0 %vm794_vm4, %v779_v54 }
 0x191   : > { %v585_v58 = vpop.xlane.xlu0 %584 }
 0x192   : > { %v589_v59 = vsub.f32 %v574_v19, %v585_v58  ;;  %v752_v19 = vld [vmem:[#allocation4] sm:$0xff] }
 0x193   : > { %v760_v22 = vmul.f32 %v758_v17, %v752_v19 }
 0x194   : > { %v591_v61 = vmul.f32 1.442695, %v589_v59 }
 0x195   : > { %v588_v62 = vpop.xlane.xlu0 %587 }
 0x196   : > { %1340 = vpow2.f32 %v591_v61  ;;  %v590_v63 = vsub.f32 %v579_v23, %v588_v62 }
 0x198   : > { %v593_v1 = vmul.f32 1.442695, %v590_v63 }
 0x19a   : > { %1342 = vpow2.f32 %v593_v1 }
 0x1a0   : > { %v1609_v5 = vpop.eup %1340 }
 0x1a1   : > { %597 = vrot.lane.b32.xlu0 %v1609_v5, %s1733_s19 }
 0x1a4   : > { %v1613_v9 = vpop.eup %1342 }
 0x1a5   : > { %599 = vrot.lane.b32.xlu1 %v1613_v9, %s1733_s19  ;;  %s1645_s19 = scalar_lea.hbm %s1731_s7, %s1736_s23 }
 0x213   : > { %v598_v13 = vpop.permute.xlu0 %597 }
 0x214   : > { %v604_v14 = vsel %vm484_vm3, %v598_v13, 0.0 }
 0x215   : > { %605 = vadd.xlane.f32.xlu0 %v604_v14 }
 0x217   : > { %v600_v15 = vpop.permute.xlu1 %599 }
 0x218   : > { %v607_v16 = vsel %vm484_vm3, %v600_v15, 0.0 }
 0x219   : > { %608 = vadd.xlane.f32.xlu1 %v607_v16 }
 0x25b   : > { %v1250_v21 = vpop.f32.mrb[2].mxu0 }
 0x25c   : > { %v877_v23 = vadd.f32 %v1250_v21, %v761_v20  ;;  %v867_v24 = vpop.f32.mrb[3].mxu0 }
 0x25d   : > { %v876_v25 = vadd.f32 %v867_v24, %v760_v22 }
 0x25e   : > { %879 = vst.msk [vmem:[#allocation4 + $0x8] sm:$0xff] %vm484_vm3, %v877_v23 }
 0x25f   : > { %878 = vst.msk [vmem:[#allocation4] sm:$0xff] %vm484_vm3, %v876_v25 }
 0x265   : > { %v885_v26 = vld [vmem:[#allocation4 + $0x8] sm:$0xff] }
 0x266   : > { %887 = vst.msk [vmem:[%s476_s22 + $0x8] sm:$0xff] %vm484_vm3, %v885_v26  ;;  %v884_v27 = vld [vmem:[#allocation4] sm:$0xff] }
 0x267   : > { %886 = vst.msk [vmem:[%s476_s22] sm:$0xff] %vm484_vm3, %v884_v27  ;;  %s1463_s22 = smov [#allocation5]  }
 0x268   : > { %s1352_s12 = sshll.u32 %s1463_s22, 4  ;;  %s1353_s12 = int_to_ptr.vmem [resolvable:$false] %s1352_s12 }
 0x269   : > { %s1354_s0 = scalar_lea.vmem %s1353_s12, 32  ;;  %p1355_p1 = scmp.lt.s32.totalorder %s938_s24, %s1353_s12 }
 0x26a   : > { %p1356_p2 = scmp.lt.s32.totalorder %s1354_s0, %s1348_s20 }
 0x26c   : > { %p1357_p3 = por %p1356_p2, %p1355_p1 }
 0x26e   : > { %p1358_p5 = pnand %p1357_p3, %p1351_p0 }
 0x2a2   : > { %v606_v28 = vpop.xlane.xlu0 %605 }
 0x2a3   : > { %1344 = vrcp.f32 %v606_v28 }
 0x2a6   : > { %v609_v29 = vpop.xlane.xlu1 %608 }
 0x2a7   : > { %1346 = vrcp.f32 %v609_v29 }
 0x2a8   : > { %1361 = shalt.err (!%p1358_p5)
}
 0x2a9   : > { %s1362_s14 = scalar_lea.hbm %s1645_s19, 16  ;;  %s1366_s22 = scalar_lea.hbm %s1731_s7, 32 }
 0x2aa   : > { %p1363_p6 = scmp.ne.s32.totalorder %s1645_s19, %s1362_s14  ;;  %p1367_p10 = scmp.lt.u32.totalorder %s1645_s19, %s1731_s7 }
 0x2ab   : > { %p1368_p11 = scmp.lt.u32.totalorder %s1366_s22, %s1362_s14  ;;  %p1370_p13 = scmp.lt.u32.totalorder %s1362_s14, %s1645_s19 }
 0x2ac   : > { %p1364_p7 = pnand %p1363_p6, %p1550_p4 }
 0x2ad   : > { %p1369_p12 = por %p1368_p11, %p1367_p10 }
 0x2ae   : > { %p1365_p9 = pneg %p1364_p7 }
 0x2af   : > { %p1371_p0 = por %p1370_p13, %p1369_p12 }
 0x2b1   : > { %p1372_p1 = pnand %p1371_p0, %p1365_p9 }
 0x2b3   : > { %1375 = shalt.err (!%p1372_p1)
}
 0x2b4   : > { %1271 = dma.vmem_to_hbm [thread:$0]  (%p1550_p4), %s938_s24, 16, %s1645_s19, %s912_s16  }
 0x2b5   : > { %s1747_s0 = sshll.u32 %s1450_s30, 4  ;;  %s1748_s26 = scalar_lea.vmem [#allocation7], %s1619_s11 }
 0x2b6   : > { %s1670_s23 = scalar_lea.hbm %s1732_s8, %s1747_s0  ;;  %s951_s22 = sshll.u32 %s1748_s26, 4  ;;  %s952_s22 = int_to_ptr.vmem [resolvable:$true] %s951_s22 }
 0x2b7   : > { %s916_s14 = scalar_lea.sflag [#allocation8], %s1619_s11  ;;  %s1376_s12 = scalar_lea.vmem %s952_s22, 16 }
 0x2b8   : > { %p1377_p2 = scmp.ne.s32.totalorder %s952_s22, %s1376_s12  ;;  %s1464_s1 = smov [#allocation7]  }
 0x2b9   : > { %s1380_s2 = sshll.u32 %s1464_s1, 4  ;;  %s1381_s2 = int_to_ptr.vmem [resolvable:$false] %s1380_s2 }
 0x2ba   : > { %p1378_p3 = pnand %p1377_p2, %p1550_p4  ;;  %s1382_s3 = scalar_lea.vmem %s1381_s2, 32 }
 0x2bb   : > { %p1383_p6 = scmp.lt.s32.totalorder %s952_s22, %s1381_s2  ;;  %p1384_p7 = scmp.lt.s32.totalorder %s1382_s3, %s1376_s12 }
 0x2bc   : > { %p1379_p5 = pneg %p1378_p3 }
 0x2bd   : > { %p1385_p9 = por %p1384_p7, %p1383_p6 }
 0x2bf   : > { %p1386_p10 = pnand %p1385_p9, %p1379_p5 }
 0x2c1   : > { %1389 = shalt.err (!%p1386_p10)
}
 0x2c2   : > { %s1390_s30 = scalar_lea.hbm %s1670_s23, 16  ;;  %s1394_s1 = scalar_lea.hbm %s1732_s8, 32 }
 0x2c3   : > { %p1391_p11 = scmp.ne.s32.totalorder %s1670_s23, %s1390_s30  ;;  %p1395_p0 = scmp.lt.u32.totalorder %s1670_s23, %s1732_s8 }
 0x2c4   : > { %p1396_p1 = scmp.lt.u32.totalorder %s1394_s1, %s1390_s30  ;;  %p1398_p3 = scmp.lt.u32.totalorder %s1390_s30, %s1670_s23 }
 0x2c5   : > { %p1392_p12 = pnand %p1391_p11, %p1550_p4 }
 0x2c6   : > { %p1397_p2 = por %p1396_p1, %p1395_p0 }
 0x2c7   : > { %p1393_p13 = pneg %p1392_p12 }
 0x2c8   : > { %p1399_p5 = por %p1398_p3, %p1397_p2 }
 0x2ca   : > { %p1400_p6 = pnand %p1399_p5, %p1393_p13 }
 0x2cc   : > { %1403 = shalt.err (!%p1400_p6)
}
 0x2cd   : > { %1272 = dma.vmem_to_hbm [thread:$0]  (%p1550_p4), %s952_s22, 16, %s1670_s23, %s916_s14   ;;  %v1345_v30 = vpop.eup %1344 }
 0x2ce   : > { %v614_v31 = vmul.f32 %v1345_v30, %v1609_v5  ;;  %s1749_s3 = smov 112   ;;  %v1347_v32 = vpop.eup %1346  ;;  %s465_s20 = scalar_lea.vmem %s1729_s5, %s1571_s21 }
 0x2cf   : > { %v615_v33 = vmul.f32 %v1347_v32, %v1613_v9 }
 0x2d0   : > { %618 = vrot.lane.b32.xlu0 %v614_v31, %s1749_s3 }
 0x2d1   : > { %620 = vrot.lane.b32.xlu1 %v615_v33, %s1749_s3 }
 0x342   : > { %v619_v34 = vpop.permute.xlu0 %618 }
 0x343   : > { %624 = vst.msk [vmem:[%s465_s20] sm:$0xff] %vm484_vm3, %v619_v34  ;;  %v621_v35 = vpop.permute.xlu1 %620 }
 0x344   : > { %625 = vst.msk [vmem:[%s465_s20 + $0x8] sm:$0xff] %vm484_vm3, %v621_v35 }
 0x345 PF: > { %p1282_p4 = scmp.ge.s32.totalorder %s1458_s10, 2  ;;  %s988_s15 = sand.u32 1, %s1438_s27  }
 0x346   : > { %s989_s25 = scalar_lea.sflag [#allocation6], %s988_s15 }
 0x347   : > { %p1276_p7 = pnand %p1282_p4, %p1557_p8 }
 0x349   : > { %1429 = dma.done.wait (!%p1276_p7), %s989_s25, 16  }
 0x34a   : > { %1431 = vsyncadd (!%p1276_p7), %s989_s25, 4294967280  ;;  %s997_s23 = scalar_lea.sflag [#allocation8], %s988_s15 }
 0x34b   : > { %1433 = dma.done.wait (!%p1276_p7), %s997_s23, 16  }
 0x34c   : > { %1435 = vsyncadd (!%p1276_p7), %s997_s23, 4294967280  ;;  %s25_s10 = sadd.s32 1, %s1458_s10   ;;  %s1750_s27 = smov %s1442_s28 }
 0x34d   : > { %p22_p9 = scmp.ge.s32.totalorder %s25_s10, 4   ;;  %s1751_s28 = smov %s1446_s29 }
 0x34e   : > { %s1752_s29 = smov %s1563_s18  ;;  %s1753_s30 = smov %s1454_s9 }
 0x34f   : > { %s1754_s9 = smov %s1756_s13  ;;  %24 = sbr.rel (!%p22_p9) target bundleno = 11 (0xb), region = 136 }
 0x356   :  { %1001 = vsyncpa [#allocation6], 1 }
 0x357   :  { %1003 = vsyncpa [#allocation6 + $0x1], 1 }
 0x358   :  { %1004 = vsyncpa [#allocation8], 1 }
 0x359   :  { %1006 = vsyncpa [#allocation8 + $0x1], 1 }

</bundles_post_ra>
